<compile_context>
chip_gen: v6e
topology: v6e:2x2x1
jax: 0.10.0
libtpu: 0.0.40
codegen_flags: <defaults>
</compile_context>

<pallas_src>
import functools

import jax
import jax.numpy as jnp
from jax.experimental import pallas as pl
from jax.experimental.pallas import tpu as pltpu


LANE = 128  # TPU vreg lane width; the hidden dim is zero-padded to this.


def _round_up(x, m):
    return (x + m - 1) // m * m


# ----------------------------------------------------------------------------
# Kernels
# ----------------------------------------------------------------------------
def rnn_cell_kernel(img_ref, h_ref, wi_ref, wh_ref, bf_ref, out_ref):
    """Single RNN step (module forward): out = relu(img @ Wi + h @ Wh + b_i + b_h).

    img : [B, image_size]  f32 (cast to bf16 for the MXU)
    h   : [B, Hp]          f32, lane-padded hidden state
    Wi  : [image_size, Hp] bf16
    Wh  : [Hp, Hp]         bf16 (padded rows/cols are zero)
    b_f : [1, Hp]          f32 (= b_i + b_h, lane-padded with zeros)
    out : [B, Hp]          f32, lane-dense (unmasked full-vreg store)
    """
    acc = jnp.dot(img_ref[...].astype(wi_ref.dtype), wi_ref[...],
                  preferred_element_type=jnp.float32)
    acc = acc + jnp.dot(h_ref[...].astype(wh_ref.dtype), wh_ref[...],
                        preferred_element_type=jnp.float32)
    out_ref[...] = jnp.maximum(acc + bf_ref[...], 0.0).astype(out_ref.dtype)


def proj_kernel(x_ref, wi_ref, bf_ref, out_ref):
    """Hoisted input projection for all timesteps: (T*B, K) @ (K, Hp) + b_f."""
    acc = jnp.dot(x_ref[...].astype(wi_ref.dtype), wi_ref[...],
                  preferred_element_type=jnp.float32)
    out_ref[...] = (acc + bf_ref[...]).astype(out_ref.dtype)


def rnn_seq_kernel(h0_ref, proj_ref, wh_ref, out_ref, h_scratch):
    """One grid step of the in-kernel recurrence: h = relu(proj[t] + h @ Wh).

    h0   : [B, Hp]      f32, initial hidden (loaded once, constant index_map)
    proj : [1, B, Hp]   f32, per-step streamed tile (image projection + fused bias)
    Wh   : [Hp, Hp]     bf16, VMEM-resident across the whole grid
    out  : [1, B, Hp]   f32, per-step hidden state (lane-dense store)
    h_scratch : [B, Hp] f32 VMEM scratch carrying the hidden state across steps
    """
    t = pl.program_id(0)

    @pl.when(t == 0)
    def _():
        h_scratch[...] = h0_ref[...]

    rec = jnp.dot(h_scratch[...].astype(wh_ref.dtype), wh_ref[...],
                  preferred_element_type=jnp.float32)
    h_new = jnp.maximum(proj_ref[0] + rec, 0.0)
    h_scratch[...] = h_new
    out_ref[0] = h_new.astype(out_ref.dtype)


# ----------------------------------------------------------------------------
# Wrappers
# ----------------------------------------------------------------------------
@jax.jit
def rnn_forward(image, hidden_padded, wi_p, wh_p, b_f):
    """Module forward semantics (one step). Returns lane-padded hidden [B, Hp]."""
    B = image.shape[0]
    Hp = wi_p.shape[1]
    vmem = pl.BlockSpec(memory_space=pltpu.MemorySpace.VMEM)
    return pl.pallas_call(
        rnn_cell_kernel,
        out_shape=jax.ShapeDtypeStruct((B, Hp), jnp.float32),
        in_specs=[vmem, vmem, vmem, vmem, vmem],
        out_specs=vmem,
    )(image, hidden_padded, wi_p, wh_p, b_f)


@jax.jit
def rnn_sequence_forward(images, h0_padded, wi_p, wh_p, b_f):
    """Drive the cell over a sequence: images [T, B, K], h0 [B, Hp] -> [T, B, Hp]."""
    T, B, image_size = images.shape
    Hp = wi_p.shape[1]
    vmem = pl.BlockSpec(memory_space=pltpu.MemorySpace.VMEM)

    # 1) Hoisted input projection for ALL timesteps as one MXU matmul (fills the
    #    M dim with T*B rows instead of B per step); bias is fused in here.
    x_flat = images.reshape(T * B, image_size)
    proj = pl.pallas_call(
        proj_kernel,
        out_shape=jax.ShapeDtypeStruct((T * B, Hp), jnp.float32),
        in_specs=[vmem, vmem, vmem],
        out_specs=vmem,
    )(x_flat, wi_p, b_f)
    proj = proj.reshape(T, B, Hp)  # contiguous row-major reshape (metadata only)

    # 2) Recurrence over time inside a single kernel launch: grid=(T,) ("arbitrary"),
    #    W_h and h0 VMEM-resident (constant index_map), hidden state in VMEM scratch,
    #    only the 4 KiB per-step proj tile streamed (double-buffered by the pipeline).
    outs = pl.pallas_call(
        rnn_seq_kernel,
        out_shape=jax.ShapeDtypeStruct((T, B, Hp), jnp.float32),
        grid=(T,),
        in_specs=[
            pl.BlockSpec((B, Hp), lambda t: (0, 0)),        # h0 (loaded once)
            pl.BlockSpec((1, B, Hp), lambda t: (t, 0, 0)),  # proj[t] streamed
            pl.BlockSpec((Hp, Hp), lambda t: (0, 0)),       # W_h resident
        ],
        out_specs=pl.BlockSpec((1, B, Hp), lambda t: (t, 0, 0)),
        scratch_shapes=[pltpu.VMEM((B, Hp), jnp.float32)],
        compiler_params=pltpu.CompilerParams(
            dimension_semantics=("arbitrary",)),
    )(h0_padded, proj, wh_p)
    return outs


# ----------------------------------------------------------------------------
# Parameter prep (done once, not per call)
# ----------------------------------------------------------------------------
def prepare_params(w_i, b_i, w_h, b_h):
    """Lane-pad and cast parameters once.

    w_i: [image_size, H], w_h: [H, H]  ([in, out] layout), b_i/b_h: [1, H].
    Returns wi_p [image_size, Hp] bf16, wh_p [Hp, Hp] bf16, b_f [1, Hp] f32.
    Padded rows of wh_p are zero so the (always-zero) padded hidden lanes contribute
    nothing; padded columns are zero so padded output lanes stay exactly 0 = relu(0).
    """
    image_size, H = w_i.shape
    Hp = _round_up(H, LANE)
    pad = Hp - H
    wi_p = jnp.pad(w_i, ((0, 0), (0, pad))).astype(jnp.bfloat16)
    wh_p = jnp.pad(w_h, ((0, pad), (0, pad))).astype(jnp.bfloat16)
    b_f = jnp.pad(jnp.reshape(b_i, (1, H)) + jnp.reshape(b_h, (1, H)),
                  ((0, 0), (0, pad))).astype(jnp.float32)
    return wi_p, wh_p, b_f


def pad_hidden(h, Hp):
    return jnp.pad(h, ((0, 0), (0, Hp - h.shape[1])))


def init_params(key, image_size, h_hidden):
    """Deterministic init mimicking nn.Linear's uniform(-1/sqrt(fan_in), 1/sqrt(fan_in))."""
    k1, k2, k3, k4 = jax.random.split(key, 4)
    bound_i = 1.0 / jnp.sqrt(image_size)
    bound_h = 1.0 / jnp.sqrt(h_hidden)
    # Stored transposed relative to PyTorch: [in, out]
    w_i = jax.random.uniform(k1, (image_size, h_hidden), jnp.float32, -bound_i, bound_i)
    b_i = jax.random.uniform(k2, (1, h_hidden), jnp.float32, -bound_i, bound_i)
    w_h = jax.random.uniform(k3, (h_hidden, h_hidden), jnp.float32, -bound_h, bound_h)
    b_h = jax.random.uniform(k4, (1, h_hidden), jnp.float32, -bound_h, bound_h)
    return w_i, b_i, w_h, b_h


# ----------------------------------------------------------------------------
# References (pure JAX)
# ----------------------------------------------------------------------------
def ref_cell_f32(image, hidden, w_i, b_i, w_h, b_h):
    return jnp.maximum(image @ w_i + b_i + hidden @ w_h + b_h, 0.0)


def ref_cell_bf16(image, hidden, w_i, b_i, w_h, b_h):
    """Same arithmetic as the kernels (bf16 MXU operands, f32 accumulate)."""
    p = jnp.dot(image.astype(jnp.bfloat16), w_i.astype(jnp.bfloat16),
                preferred_element_type=jnp.float32)
    r = jnp.dot(hidden.astype(jnp.bfloat16), w_h.astype(jnp.bfloat16),
                preferred_element_type=jnp.float32)
    return jnp.maximum(p + r + b_i + b_h, 0.0)


if __name__ == "__main__":
    key = jax.random.PRNGKey(0)
    k_img, k_hid, k_par, k_seq = jax.random.split(key, 4)

    batch = 8
    image_size = 64
    h_hidden = 32
    seq_len = 8

    w_i, b_i, w_h, b_h = init_params(k_par, image_size, h_hidden)
    wi_p, wh_p, b_f = prepare_params(w_i, b_i, w_h, b_h)
    Hp = wi_p.shape[1]

    # ---- single step (exact module forward semantics) ----
    image = jax.random.normal(k_img, (batch, image_size), jnp.float32)
    hidden = jax.random.normal(k_hid, (batch, h_hidden), jnp.float32)
    hidden_p = pad_hidden(hidden, Hp)

    out_p = rnn_forward(image, hidden_p, wi_p, wh_p, b_f)
    jax.block_until_ready(out_p)
    assert out_p.shape == (batch, Hp)
    assert jnp.all(out_p[:, h_hidden:] == 0.0)          # padded lanes stay zero
    out = out_p[:, :h_hidden]                            # slice once, at the end

    ref_bf = ref_cell_bf16(image, hidden, w_i, b_i, w_h, b_h)
    ref_f32 = ref_cell_f32(image, hidden, w_i, b_i, w_h, b_h)
    assert jnp.allclose(out, ref_bf, atol=2e-2, rtol=2e-2)
    assert jnp.allclose(out, ref_f32, atol=1.5e-1, rtol=1.5e-1)  # bf16-operand tolerance

    # ---- sequence mode: recurrence loop inside the kernel ----
    images = jax.random.normal(k_seq, (seq_len, batch, image_size), jnp.float32)
    h0_p = pad_hidden(hidden, Hp)

    outs_p = rnn_sequence_forward(images, h0_p, wi_p, wh_p, b_f)
    jax.block_until_ready(outs_p)
    assert outs_p.shape == (seq_len, batch, Hp)
    assert jnp.all(outs_p[..., h_hidden:] == 0.0)

    # bf16-matched pure-JAX reference recurrence.
    h_ref = hidden
    refs = []
    for t in range(seq_len):
        h_ref = ref_cell_bf16(images[t], h_ref, w_i, b_i, w_h, b_h)
        refs.append(h_ref)
    refs = jnp.stack(refs, axis=0)
    assert jnp.allclose(outs_p[..., :h_hidden], refs, atol=2e-2, rtol=2e-2)

    print("KERNEL_OK")
</pallas_src>

<mosaic_0001>
module attributes {stable_mosaic.version = 11 : i64} {
  func.func @rnn_cell_kernel(%arg0: memref<8x64xf32, #tpu.memory_space<vmem>>, %arg1: memref<8x128xf32, #tpu.memory_space<vmem>>, %arg2: memref<64x128xbf16, #tpu.memory_space<vmem>>, %arg3: memref<128x128xbf16, #tpu.memory_space<vmem>>, %arg4: memref<1x128xf32, #tpu.memory_space<vmem>>, %arg5: memref<8x128xf32, #tpu.memory_space<vmem>>) attributes {dimension_semantics = [], scalar_prefetch = 0 : i64, scratch_operands = 0 : i64, tpu.core_type = #tpu.core_type<tc>} {
    %c0 = arith.constant 0 : index
    %c0_0 = arith.constant 0 : index
    %0 = vector.load %arg0[%c0, %c0_0] : memref<8x64xf32, #tpu.memory_space<vmem>>, vector<8x64xf32>
    %1 = arith.truncf %0 : vector<8x64xf32> to vector<8x64xbf16>
    %c0_1 = arith.constant 0 : index
    %c0_2 = arith.constant 0 : index
    %2 = vector.load %arg2[%c0_1, %c0_2] : memref<64x128xbf16, #tpu.memory_space<vmem>>, vector<64x128xbf16>
    %cst = arith.constant dense<0.000000e+00> : vector<8x128xf32>
    %3 = tpu.matmul %1, %2, %cst {dimension_numbers = #tpu.dot_dimension_numbers<[1], [0], [0], [1], [0, 0, 1, 1], [], []>} : vector<8x64xbf16>, vector<64x128xbf16>, vector<8x128xf32> -> vector<8x128xf32>
    %c0_3 = arith.constant 0 : index
    %c0_4 = arith.constant 0 : index
    %4 = vector.load %arg1[%c0_3, %c0_4] : memref<8x128xf32, #tpu.memory_space<vmem>>, vector<8x128xf32>
    %5 = arith.truncf %4 : vector<8x128xf32> to vector<8x128xbf16>
    %c0_5 = arith.constant 0 : index
    %c0_6 = arith.constant 0 : index
    %6 = vector.load %arg3[%c0_5, %c0_6] : memref<128x128xbf16, #tpu.memory_space<vmem>>, vector<128x128xbf16>
    %cst_7 = arith.constant dense<0.000000e+00> : vector<8x128xf32>
    %7 = tpu.matmul %5, %6, %cst_7 {dimension_numbers = #tpu.dot_dimension_numbers<[1], [0], [0], [1], [0, 0, 1, 1], [], []>} : vector<8x128xbf16>, vector<128x128xbf16>, vector<8x128xf32> -> vector<8x128xf32>
    %8 = arith.addf %3, %7 : vector<8x128xf32>
    %c0_8 = arith.constant 0 : index
    %c0_9 = arith.constant 0 : index
    %9 = vector.load %arg4[%c0_8, %c0_9] : memref<1x128xf32, #tpu.memory_space<vmem>>, vector<1x128xf32>
    %10 = vector.broadcast %9 : vector<1x128xf32> to vector<8x128xf32>
    %11 = arith.addf %8, %10 : vector<8x128xf32>
    %cst_10 = arith.constant 0.000000e+00 : f32
    %12 = vector.broadcast %cst_10 : f32 to vector<8x128xf32>
    %13 = arith.maximumf %11, %12 : vector<8x128xf32>
    %c0_11 = arith.constant 0 : index
    %c0_12 = arith.constant 0 : index
    %14 = vector.load %arg5[%c0_11, %c0_12] : memref<8x128xf32, #tpu.memory_space<vmem>>, vector<8x128xf32>
    tpu.vector_store %arg5[%c0_11, %c0_12], %13 {strides = array<i32>} : memref<8x128xf32, #tpu.memory_space<vmem>>, vector<8x128xf32>,
    return
  }
}

</mosaic_0001>

<bundles_post_ra>
// kernel: rnn_forward.1
= control target key start
LH: loop header
LB: loop body
LE: loop exit
PB: predicated region body
PF: predicated region fallthrough
CT: control target
= control target key end

     0   :  { %10 = vsyncpa [#allocation3], 0  ;;  %s530_s0 = inlined_call_operand.hbm [shape: f32[8,64], index: 0, kind: input, shape index: {}]   ;;  %s531_s1 = inlined_call_operand.hbm [shape: f32[8,128], index: 1, kind: input, shape index: {}]   ;;  %s532_s2 = inlined_call_operand.hbm [shape: bf16[64,128], index: 2, kind: input, shape index: {}]   ;;  %s533_s3 = inlined_call_operand.hbm [shape: bf16[128,128], index: 3, kind: input, shape index: {}]   ;;  %s534_s4 = inlined_call_operand.vmem [shape: f32[1,128], index: 4, kind: input, shape index: {}]   ;;  %s535_s5 = inlined_call_operand.hbm [shape: f32[8,128], index: 5, kind: output, shape index: {}]  }
   0x1   :  { %11 = vsyncpa [#allocation6], 0 }
   0x2   :  { %12 = vsyncpa [#allocation9], 0 }
   0x3   :  { %13 = vsyncpa [#allocation4], 0  ;;  %s473_s18 = smov [#allocation5]   ;;  %s474_s20 = smov [#allocation2]  }
   0x4   :  { %s30_s19 = sshll.u32 %s473_s18, 4  ;;  %s20_s21 = sshll.u32 %s474_s20, 4  ;;  %s31_s19 = int_to_ptr.vmem [resolvable:$true] %s30_s19  ;;  %s21_s21 = int_to_ptr.vmem [resolvable:$true] %s20_s21 }
   0x5   :  { %s373_s22 = scalar_lea.vmem %s31_s19, 128  ;;  %p378_p1 = scmp.lt.s32.totalorder %s31_s19, %s31_s19 }
   0x6   :  { %p374_p0 = scmp.ne.s32.totalorder %s31_s19, %s373_s22  ;;  %p379_p2 = scmp.lt.s32.totalorder %s373_s22, %s373_s22 }
   0x8   :  { %p380_p3 = por %p379_p2, %p378_p1 }
   0xa   :  { %p381_p4 = pnand %p380_p3, %p374_p0 }
   0xc   :  { %384 = shalt.err (!%p381_p4)
}
   0xd   :  { %33 = dma.hbm_to_vmem [thread:$0]  %s531_s1, 128, %s31_s19, [#allocation6]  }
   0xe   :  { %s393_s25 = scalar_lea.vmem %s21_s21, 128  ;;  %p398_p6 = scmp.lt.s32.totalorder %s21_s21, %s21_s21 }
   0xf   :  { %p394_p5 = scmp.ne.s32.totalorder %s21_s21, %s393_s25  ;;  %p399_p7 = scmp.lt.s32.totalorder %s393_s25, %s393_s25 }
  0x11   :  { %p400_p8 = por %p399_p7, %p398_p6 }
  0x13   :  { %p401_p9 = pnand %p400_p8, %p394_p5 }
  0x15   :  { %404 = shalt.err (!%p401_p9)
}
  0x16   :  { %23 = dma.hbm_to_vmem [thread:$0]  %s530_s0, 128, %s21_s21, [#allocation3]  }
  0x17   :  { %s475_s28 = smov [#allocation7]  }
  0x18   :  { %s39_s29 = sshll.u32 %s475_s28, 4  ;;  %s40_s29 = int_to_ptr.vmem [resolvable:$true] %s39_s29 }
  0x19   :  { %s413_s30 = scalar_lea.vmem %s40_s29, 512  ;;  %p418_p11 = scmp.lt.s32.totalorder %s40_s29, %s40_s29 }
  0x1a   :  { %p414_p10 = scmp.ne.s32.totalorder %s40_s29, %s413_s30  ;;  %p419_p12 = scmp.lt.s32.totalorder %s413_s30, %s413_s30 }
  0x1c   :  { %p420_p13 = por %p419_p12, %p418_p11 }
  0x1e   :  { %p421_p0 = pnand %p420_p13, %p414_p10 }
  0x20   :  { %424 = shalt.err (!%p421_p0)
}
  0x21   :  { %s476_s1 = smov 64   ;;  %s477_s6 = smov 4  }
  0x22   :  { %45 = dma.hbm_to_vmem [thread:$0]  %s532_s2, 512, %s40_s29, [#allocation6], %s476_s1, %s476_s1, %s477_s6  }
  0x23   :  { %s478_s9 = smov [#allocation8]  }
  0x24   :  { %s51_s10 = sshll.u32 %s478_s9, 4  ;;  %s52_s10 = int_to_ptr.vmem [resolvable:$true] %s51_s10 }
  0x25   :  { %s433_s0 = scalar_lea.vmem %s52_s10, 1024  ;;  %p438_p2 = scmp.lt.s32.totalorder %s52_s10, %s52_s10 }
  0x26   :  { %p434_p1 = scmp.ne.s32.totalorder %s52_s10, %s433_s0  ;;  %p439_p3 = scmp.lt.s32.totalorder %s433_s0, %s433_s0 }
  0x28   :  { %p440_p4 = por %p439_p3, %p438_p2 }
  0x2a   :  { %p441_p5 = pnand %p440_p4, %p434_p1 }
  0x2c   :  { %444 = shalt.err (!%p441_p5)
}
  0x2d   :  { %57 = dma.hbm_to_vmem [thread:$0]  %s533_s3, 1024, %s52_s10, [#allocation9], %s476_s1, %s476_s1, %s477_s6  }
  0x2e   :  { %465 = dma.done.wait [#allocation3], 128  }
  0x2f   :  { %466 = vsyncadd [#allocation3], 4294967168 }
  0x30   :  { %467 = dma.done.wait [#allocation6], 640  }
  0x31   :  { %468 = vsyncadd [#allocation6], 4294966656 }
  0x32   :  { %469 = dma.done.wait [#allocation9], 1024  }
  0x33   :  { %470 = vsyncadd [#allocation9], 4294966272  ;;  %v479_v0 = vmov 0.0   ;;  %vm480_vm0 = vmmov 0   ;;  %v353_v1 = vld [vmem:[#allocation8 + $0x38] sm:$0xff]   ;;  %v354_v2 = vld [vmem:[#allocation8 + $0x30] sm:$0xff]  }
  0x34   :  { %312 = vmatprep.subr.bf16.mxu0 %v479_v0  ;;  %332 = vmatprep.subr.bf16.mxu1 %v479_v0  ;;  %v356_v3 = vld [vmem:[#allocation7 + $0x18] sm:$0xff]   ;;  %v358_v4 = vld [vmem:[#allocation7 + $0x10] sm:$0xff]   ;;  %v355_v5 = vld [vmem:[#allocation8 + $0x28] sm:$0xff]   ;;  %vm213_vm1 = vcmask 523264   ;;  %s481_s13 = smov [#allocation10]  }
  0x35   :  { %340 = vmatprep.mubr.msk.bf16.mxu1 %vm480_vm0, %v479_v0  ;;  %328 = vmatprep.mubr.msk.bf16.mxu0 %vm480_vm0, %v479_v0  ;;  %v360_v6 = vld [vmem:[#allocation7 + $0x8] sm:$0xff]   ;;  %v357_v7 = vld [vmem:[#allocation8 + $0x20] sm:$0xff]   ;;  %v73_v9 = vld [vmem:[#allocation2] sm:$0xff]  ;;  %s273_s14 = sshll.u32 %s481_s13, 4  ;;  %s274_s14 = int_to_ptr.vmem [resolvable:$true] %s273_s14 }
  0x36   :  { %313 = vmatpush3.bf16.msra.mxu0 %v353_v1  ;;  %333 = vmatpush3.bf16.msra.mxu1 %v356_v3  ;;  %v362_v8 = vld [vmem:[#allocation7] sm:$0xff]   ;;  %v359_v10 = vld [vmem:[#allocation8 + $0x18] sm:$0xff]   ;;  %v74_v11 = vpack.c.bf16 %v73_v9, %v73_v9  ;;  %v361_v12 = vld [vmem:[#allocation8 + $0x10] sm:$0xff]   ;;  %s445_s15 = scalar_lea.vmem %s274_s14, 128  ;;  %p450_p7 = scmp.lt.s32.totalorder %s274_s14, %s274_s14 }
  0x37   :  { %314 = vmatprep.subr.bf16.mxu0 %v479_v0  ;;  %334 = vmatprep.subr.bf16.mxu1 %v479_v0  ;;  %v363_v13 = vld [vmem:[#allocation8 + $0x8] sm:$0xff]   ;;  %v364_v14 = vld [vmem:[#allocation8] sm:$0xff]   ;;  %v83_v15 = vld [vmem:[#allocation5] sm:$0xff]  ;;  %p446_p6 = scmp.ne.s32.totalorder %s274_s14, %s445_s15  ;;  %p451_p8 = scmp.lt.s32.totalorder %s445_s15, %s445_s15 }
  0x38   :  { %v84_v16 = vpack.c.bf16 %v83_v15, %v83_v15  ;;  %v297_v22 = vld [vmem:[%s534_s4] ss:$0 sm:$0xff] }
  0x39   :  { %p452_p9 = por %p451_p8, %p450_p7 }
  0x3a   :  { %315 = vmatpush3.bf16.msra.mxu0 %v354_v2  ;;  %335 = vmatpush3.bf16.msra.mxu1 %v358_v4 }
  0x3b   :  { %316 = vmatprep.subr.bf16.mxu0 %v479_v0  ;;  %336 = vmatprep.subr.bf16.mxu1 %v479_v0  ;;  %p453_p10 = pnand %p452_p9, %p446_p6 }
  0x3e   :  { %317 = vmatpush3.bf16.msra.mxu0 %v355_v5  ;;  %337 = vmatpush3.bf16.msra.mxu1 %v360_v6 }
  0x3f   :  { %318 = vmatprep.subr.bf16.mxu0 %v479_v0  ;;  %338 = vmatprep.subr.bf16.mxu1 %v479_v0 }
  0x42   :  { %319 = vmatpush3.bf16.msra.mxu0 %v357_v7  ;;  %339 = vmatpush3.bf16.msra.mxu1 %v362_v8 }
  0x43   :  { %320 = vmatprep.subr.bf16.mxu0 %v479_v0 }
  0x45   :  { %341 = vmatmul.mubr.msk.bf16.vlgmr.msra.gmra.mxu1 %vm213_vm1, %v74_v11 }
  0x46   :  { %321 = vmatpush3.bf16.msra.mxu0 %v359_v10 }
  0x47   :  { %322 = vmatprep.subr.bf16.mxu0 %v479_v0 }
  0x4a   :  { %323 = vmatpush3.bf16.msra.mxu0 %v361_v12 }
  0x4b   :  { %324 = vmatprep.subr.bf16.mxu0 %v479_v0 }
  0x4e   :  { %325 = vmatpush3.bf16.msra.mxu0 %v363_v13 }
  0x4f   :  { %326 = vmatprep.subr.bf16.mxu0 %v479_v0 }
  0x52   :  { %327 = vmatpush3.bf16.msra.mxu0 %v364_v14 }
  0x55   :  { %329 = vmatmul.mubr.bf16.vlgmr.msra.gmra.mxu0 %v84_v16 }
 0x105   :  { %v251_v17 = vpop.f32.mrf.mxu1 }
 0x107   :  { %v342_v18 = vpop.f32.mrf.mxu1 }
 0x109   :  { %v254_v19 = vpop.f32.mrf.mxu1 }
 0x10b   :  { %v343_v20 = vpop.f32.mrf.mxu1 }
 0x115   :  { %v183_v21 = vpop.f32.mrf.mxu0 }
 0x116   :  { %v252_v23 = vadd.f32 %v251_v17, %v183_v21 }
 0x117   :  { %v330_v24 = vpop.f32.mrf.mxu0 }
 0x118   :  { %v264_v25 = vadd.f32 %v297_v22, %v252_v23 }
 0x119   :  { %v186_v26 = vpop.f32.mrf.mxu0 }
 0x11a   :  { %v265_v27 = vmax.f32 %v264_v25, 0.0 }
 0x11b   :  { %v331_v28 = vpop.f32.mrf.mxu0 }
 0x11c   :  { %266 = vst [vmem:[#allocation10] sm:$0xff] %v265_v27 }
 0x11d   :  { %456 = shalt.err (!%p453_p10)
}
 0x11e   :  { %276 = dma.vmem_to_hbm [thread:$0]  %s274_s14, 128, %s535_s5, [#allocation4]  }
 0x11f   :  { %471 = dma.done.wait [#allocation4], 128  }
 0x120   :  { %472 = vsyncadd [#allocation4], 4294967168 }
 0x121   :  { %280 = vsyncpa [#allocation3], 1 }
 0x122   :  { %281 = vsyncpa [#allocation6], 1 }
 0x123   :  { %282 = vsyncpa [#allocation9], 1 }
 0x124   :  { %283 = vsyncpa [#allocation4], 1 }

</bundles_post_ra>
